<compile_context>
chip_gen: v5e
topology: v5e:2x2
jax: 0.10.0
libtpu: 0.0.40
codegen_flags: <defaults>
</compile_context>

<pallas_src>
import math

import jax
import jax.numpy as jnp
from jax.experimental import pallas as pl
from jax.experimental.pallas import tpu as pltpu

_LANES = 128
_HIDDEN = 128


def _mlp_bandit_kernel(w1_ref, b1_ref, w2_ref, b2_ref, w3_ref, b3_ref, o_ref):
    # Layer 1: Linear(1, 128)(1.0) + ReLU.  The module's input is the constant
    # scalar 1.0, so this collapses to relu(W1^T + b1): a single VPU add, no MXU,
    # no scalar operand.
    h1 = jnp.maximum(w1_ref[...] + b1_ref[...], 0.0)                      # (1, 128)

    # Layer 2: Linear(128, 128) + ReLU on the MXU (f32 accumulate, exact parity).
    h2 = jnp.dot(h1, w2_ref[...], preferred_element_type=jnp.float32) + b2_ref[...]
    h2 = jnp.maximum(h2, 0.0)                                             # (1, 128)

    # Output layer: Linear(128, k_pad), lane-dense (zero-padded to a 128 multiple
    # at init time), so the store is an unmasked vst of a full-lane slab.
    o_ref[...] = (
        jnp.dot(h2, w3_ref[...], preferred_element_type=jnp.float32) + b3_ref[...]
    )


def neural_network_bandit_forward(params, k):
    """3-layer MLP forward in a single un-gridded Pallas kernel.

    params (all float32, already laid out / padded by init_bandit_params):
      w1t: (1, 128)      (= W1^T)        b1: (1, 128)
      w2t: (128, 128)    (= W2^T)        b2: (1, 128)
      w3t: (128, k_pad)  (= W3^T, zero-padded)   b3: (1, k_pad)
    returns: (k,) action values
    """
    k_pad = params["w3t"].shape[1]
    vmem = pl.BlockSpec(memory_space=pltpu.MemorySpace.VMEM)

    out = pl.pallas_call(
        _mlp_bandit_kernel,
        out_shape=jax.ShapeDtypeStruct((1, k_pad), jnp.float32),
        in_specs=[vmem] * 6,
        out_specs=vmem,
    )(
        params["w1t"], params["b1"],
        params["w2t"], params["b2"],
        params["w3t"], params["b3"],
    )
    return out[0, :k]  # exact: padded columns are zero and never used


def init_bandit_params(key, k):
    """Deterministic init mimicking torch.nn.Linear default
    (U[-1/sqrt(fan_in), 1/sqrt(fan_in)]).  All layout work — transpose, bias
    reshape, and k -> k_pad zero-padding — happens here (once per weight update),
    never in the forward path."""
    keys = jax.random.split(key, 6)

    def linear(wkey, bkey, fan_in, fan_out):
        bound = 1.0 / math.sqrt(fan_in)
        w = jax.random.uniform(wkey, (fan_out, fan_in), jnp.float32, -bound, bound)
        b = jax.random.uniform(bkey, (fan_out,), jnp.float32, -bound, bound)
        return w, b

    w1, b1 = linear(keys[0], keys[1], 1, _HIDDEN)        # input_layer:  Linear(1, 128)
    w2, b2 = linear(keys[2], keys[3], _HIDDEN, _HIDDEN)  # hidden_layer: Linear(128, 128)
    w3, b3 = linear(keys[4], keys[5], _HIDDEN, k)        # output_layer: Linear(128, k)

    k_pad = pl.cdiv(k, _LANES) * _LANES                  # lane-dense output width
    w3t = w3.T                                           # (128, k)
    b3r = b3.reshape(1, k)
    if k_pad != k:
        w3t = jnp.pad(w3t, ((0, 0), (0, k_pad - k)))
        b3r = jnp.pad(b3r, ((0, 0), (0, k_pad - k)))

    return dict(
        w1t=w1.T,                          # (1, 128)
        b1=b1.reshape(1, _HIDDEN),         # (1, 128)
        w2t=w2.T,                          # (128, 128)
        b2=b2.reshape(1, _HIDDEN),         # (1, 128)
        w3t=w3t,                           # (128, k_pad)
        b3=b3r,                            # (1, k_pad)
        k=k,
    )


def reference_forward(p, k):
    """Pure-JAX reference of the module's forward() (input = constant 1.0)."""
    x = jnp.ones((1, 1), dtype=jnp.float32)
    h1 = jnp.maximum(x @ p["w1t"] + p["b1"], 0.0)
    h2 = jnp.maximum(h1 @ p["w2t"] + p["b2"], 0.0)
    return (h2 @ p["w3t"] + p["b3"])[0, :k]


if __name__ == "__main__":
    k = 8  # number of bandit arms
    key = jax.random.PRNGKey(0)
    params = init_bandit_params(key, k)

    action_values = neural_network_bandit_forward(params, k)
    action_values = jax.block_until_ready(action_values)

    # Sanity-check against a pure-JAX reference.
    ref = reference_forward(params, k)
    assert action_values.shape == (k,)
    assert jnp.allclose(action_values, ref, atol=1e-5, rtol=1e-5)

    print("KERNEL_OK")
</pallas_src>

<mosaic_0001>
module attributes {stable_mosaic.version = 11 : i64} {
  func.func @_mlp_bandit_kernel(%arg0: memref<1x128xf32, #tpu.memory_space<vmem>>, %arg1: memref<1x128xf32, #tpu.memory_space<vmem>>, %arg2: memref<128x128xf32, #tpu.memory_space<vmem>>, %arg3: memref<1x128xf32, #tpu.memory_space<vmem>>, %arg4: memref<128x128xf32, #tpu.memory_space<vmem>>, %arg5: memref<1x128xf32, #tpu.memory_space<vmem>>, %arg6: memref<1x128xf32, #tpu.memory_space<vmem>>) attributes {dimension_semantics = [], scalar_prefetch = 0 : i64, scratch_operands = 0 : i64, tpu.core_type = #tpu.core_type<tc>} {
    %c0 = arith.constant 0 : index
    %c0_0 = arith.constant 0 : index
    %0 = vector.load %arg0[%c0, %c0_0] : memref<1x128xf32, #tpu.memory_space<vmem>>, vector<1x128xf32>
    %c0_1 = arith.constant 0 : index
    %c0_2 = arith.constant 0 : index
    %1 = vector.load %arg1[%c0_1, %c0_2] : memref<1x128xf32, #tpu.memory_space<vmem>>, vector<1x128xf32>
    %2 = arith.addf %0, %1 : vector<1x128xf32>
    %cst = arith.constant 0.000000e+00 : f32
    %3 = vector.broadcast %cst : f32 to vector<1x128xf32>
    %4 = arith.maximumf %2, %3 : vector<1x128xf32>
    %c0_3 = arith.constant 0 : index
    %c0_4 = arith.constant 0 : index
    %5 = vector.load %arg2[%c0_3, %c0_4] : memref<128x128xf32, #tpu.memory_space<vmem>>, vector<128x128xf32>
    %cst_5 = arith.constant dense<0.000000e+00> : vector<1x128xf32>
    %6 = tpu.matmul %4, %5, %cst_5 {dimension_numbers = #tpu.dot_dimension_numbers<[1], [0], [0], [1], [0, 0, 1, 1], [], []>} : vector<1x128xf32>, vector<128x128xf32>, vector<1x128xf32> -> vector<1x128xf32>
    %c0_6 = arith.constant 0 : index
    %c0_7 = arith.constant 0 : index
    %7 = vector.load %arg3[%c0_6, %c0_7] : memref<1x128xf32, #tpu.memory_space<vmem>>, vector<1x128xf32>
    %8 = arith.addf %6, %7 : vector<1x128xf32>
    %cst_8 = arith.constant 0.000000e+00 : f32
    %9 = vector.broadcast %cst_8 : f32 to vector<1x128xf32>
    %10 = arith.maximumf %8, %9 : vector<1x128xf32>
    %c0_9 = arith.constant 0 : index
    %c0_10 = arith.constant 0 : index
    %11 = vector.load %arg4[%c0_9, %c0_10] : memref<128x128xf32, #tpu.memory_space<vmem>>, vector<128x128xf32>
    %cst_11 = arith.constant dense<0.000000e+00> : vector<1x128xf32>
    %12 = tpu.matmul %10, %11, %cst_11 {dimension_numbers = #tpu.dot_dimension_numbers<[1], [0], [0], [1], [0, 0, 1, 1], [], []>} : vector<1x128xf32>, vector<128x128xf32>, vector<1x128xf32> -> vector<1x128xf32>
    %c0_12 = arith.constant 0 : index
    %c0_13 = arith.constant 0 : index
    %13 = vector.load %arg5[%c0_12, %c0_13] : memref<1x128xf32, #tpu.memory_space<vmem>>, vector<1x128xf32>
    %14 = arith.addf %12, %13 : vector<1x128xf32>
    %c0_14 = arith.constant 0 : index
    %c0_15 = arith.constant 0 : index
    %15 = vector.load %arg6[%c0_14, %c0_15] : memref<1x128xf32, #tpu.memory_space<vmem>>, vector<1x128xf32>
    tpu.vector_store %arg6[%c0_14, %c0_15], %14 {strides = array<i32>} : memref<1x128xf32, #tpu.memory_space<vmem>>, vector<1x128xf32>,
    return
  }
}

</mosaic_0001>

<bundles_post_ra>
// kernel: tpu_custom_call.1
= control target key start
LH: loop header
LB: loop body
LE: loop exit
PB: predicated region body
PF: predicated region fallthrough
CT: control target
= control target key end

     0   :  { %11 = vsyncpa [#allocation3], 0  ;;  %s380_s0 = inlined_call_operand.hbm [shape: f32[1,128], index: 0, kind: input, shape index: {}]   ;;  %s381_s1 = inlined_call_operand.hbm [shape: f32[1,128], index: 1, kind: input, shape index: {}]   ;;  %s382_s2 = inlined_call_operand.hbm [shape: f32[128,128], index: 2, kind: input, shape index: {}]   ;;  %s383_s3 = inlined_call_operand.vmem [shape: f32[1,128], index: 3, kind: input, shape index: {}]   ;;  %s384_s4 = inlined_call_operand.hbm [shape: f32[128,128], index: 4, kind: input, shape index: {}]   ;;  %s385_s5 = inlined_call_operand.vmem [shape: f32[1,128], index: 5, kind: input, shape index: {}]   ;;  %s386_s6 = inlined_call_operand.hbm [shape: f32[1,128], index: 6, kind: output, shape index: {}]  }
   0x1   :  { %12 = vsyncpa [#allocation6], 0 }
   0x2   :  { %13 = vsyncpa [#allocation9], 0  ;;  %s31_s23 = sshll.u32 %s381_s1, 4  ;;  %s32_s23 = int_to_ptr.hbm [resolvable:$true] %s31_s23 }
   0x3   :  { %14 = vsyncpa [#allocation4], 0  ;;  %s317_s24 = smov [#allocation5]   ;;  %s20_s28 = sshll.u32 %s380_s0, 4  ;;  %s21_s28 = int_to_ptr.hbm [resolvable:$true] %s20_s28 }
   0x4   :  { %s33_s25 = sshll.u32 %s317_s24, 4  ;;  %s318_s29 = smov [#allocation2]   ;;  %s34_s25 = int_to_ptr.vmem [resolvable:$true] %s33_s25 }
   0x5   :  { %36 = dma.hbm_to_vmem [thread:$0]  %s32_s23, 16, %s34_s25, [#allocation6]  }
   0x6   :  { %s22_s30 = sshll.u32 %s318_s29, 4  ;;  %s41_s9 = sshll.u32 %s382_s2, 4  ;;  %s23_s30 = int_to_ptr.vmem [resolvable:$true] %s22_s30  ;;  %s42_s9 = int_to_ptr.hbm [resolvable:$true] %s41_s9 }
   0x7   :  { %25 = dma.hbm_to_vmem [thread:$0]  %s21_s28, 16, %s23_s30, [#allocation3]  }
   0x8   :  { %s319_s1 = smov [#allocation7]   ;;  %s56_s13 = sshll.u32 %s384_s4, 4  ;;  %s57_s13 = int_to_ptr.hbm [resolvable:$true] %s56_s13 }
   0x9   :  { %s43_s10 = sshll.u32 %s319_s1, 4  ;;  %s320_s14 = smov 128   ;;  %s44_s10 = int_to_ptr.vmem [resolvable:$true] %s43_s10 }
   0xa   :  { %s321_s0 = smov 8   ;;  %s322_s15 = smov [#allocation8]  }
   0xb   :  { %49 = dma.hbm_to_vmem [thread:$0]  %s42_s9, 2048, %s44_s10, [#allocation6], %s320_s14, %s320_s14, %s321_s0  }
   0xc   :  { %s58_s16 = sshll.u32 %s322_s15, 4  ;;  %s59_s16 = int_to_ptr.vmem [resolvable:$true] %s58_s16 }
   0xd   :  { %64 = dma.hbm_to_vmem [thread:$0]  %s57_s13, 2048, %s59_s16, [#allocation9], %s320_s14, %s320_s14, %s321_s0  }
   0xe   :  { %309 = dma.done.wait [#allocation3], 16  }
   0xf   :  { %310 = vsyncadd [#allocation3], 4294967280 }
  0x10   :  { %311 = dma.done.wait [#allocation6], 2064  }
  0x11   :  { %312 = vsyncadd [#allocation6], 4294965232 }
  0x12   :  { %313 = dma.done.wait [#allocation9], 2048  }
  0x13   :  { %314 = vsyncadd [#allocation9], 4294965248  ;;  %v102_v0 = vld [vmem:[#allocation7 + $0x78] sm:$0xff]  ;;  %v101_v1 = vld [vmem:[#allocation7 + $0x70] sm:$0xff]  ;;  %s323_s19 = smov [#allocation10]   ;;  %s170_s23 = sshll.u32 %s386_s6, 4  ;;  %s171_s23 = int_to_ptr.hbm [resolvable:$true] %s170_s23 }
  0x14   :  { %104 = vmatpush.msra.mxu0 %v102_v0  ;;  %v100_v2 = vld [vmem:[#allocation7 + $0x68] sm:$0xff]  ;;  %v99_v3 = vld [vmem:[#allocation7 + $0x60] sm:$0xff]  ;;  %v98_v4 = vld [vmem:[#allocation7 + $0x58] sm:$0xff]  ;;  %s168_s20 = sshll.u32 %s323_s19, 4  ;;  %s169_s20 = int_to_ptr.vmem [resolvable:$true] %s168_s20 }
  0x15   :  { %v140_v5 = vld [vmem:[#allocation8 + $0x78] sm:$0xff]  ;;  %v139_v6 = vld [vmem:[#allocation8 + $0x70] sm:$0xff]  ;;  %v138_v8 = vld [vmem:[#allocation8 + $0x68] sm:$0xff] }
  0x16   :  { %105 = vmatpush.msra.mxu0 %v101_v1  ;;  %142 = vmatpush.msra.mxu1 %v140_v5  ;;  %v97_v7 = vld [vmem:[#allocation7 + $0x50] sm:$0xff]  ;;  %v96_v9 = vld [vmem:[#allocation7 + $0x48] sm:$0xff]  ;;  %v137_v10 = vld [vmem:[#allocation8 + $0x60] sm:$0xff] }
  0x17   :  { %v95_v11 = vld [vmem:[#allocation7 + $0x40] sm:$0xff]  ;;  %v136_v12 = vld [vmem:[#allocation8 + $0x58] sm:$0xff]  ;;  %v135_v14 = vld [vmem:[#allocation8 + $0x50] sm:$0xff] }
  0x18   :  { %106 = vmatpush.msra.mxu0 %v100_v2  ;;  %143 = vmatpush.msra.mxu1 %v139_v6  ;;  %v94_v13 = vld [vmem:[#allocation7 + $0x38] sm:$0xff]  ;;  %v93_v15 = vld [vmem:[#allocation7 + $0x30] sm:$0xff]  ;;  %v134_v16 = vld [vmem:[#allocation8 + $0x48] sm:$0xff] }
  0x19   :  { %v92_v17 = vld [vmem:[#allocation7 + $0x28] sm:$0xff]  ;;  %v133_v18 = vld [vmem:[#allocation8 + $0x40] sm:$0xff]  ;;  %v132_v20 = vld [vmem:[#allocation8 + $0x38] sm:$0xff] }
  0x1a   :  { %107 = vmatpush.msra.mxu0 %v99_v3  ;;  %144 = vmatpush.msra.mxu1 %v138_v8  ;;  %v91_v19 = vld [vmem:[#allocation7 + $0x20] sm:$0xff]  ;;  %v83_v21 = vld [vmem:[#allocation2] sm:$0x1]  ;;  %v84_v22 = vld [vmem:[#allocation5] sm:$0x1] }
  0x1b   :  { %v90_v23 = vld [vmem:[#allocation7 + $0x18] sm:$0xff]  ;;  %v131_v24 = vld [vmem:[#allocation8 + $0x30] sm:$0xff]  ;;  %v85_v26 = vadd.f32 %v84_v22, %v83_v21  ;;  %v130_v27 = vld [vmem:[#allocation8 + $0x28] sm:$0xff] }
  0x1c   :  { %108 = vmatpush.msra.mxu0 %v98_v4  ;;  %145 = vmatpush.msra.mxu1 %v137_v10  ;;  %v89_v25 = vld [vmem:[#allocation7 + $0x10] sm:$0xff]  ;;  %v88_v28 = vld [vmem:[#allocation7 + $0x8] sm:$0xff]  ;;  %v129_v29 = vld [vmem:[#allocation8 + $0x20] sm:$0xff] }
  0x1d   :  { %v87_v30 = vld [vmem:[#allocation7] sm:$0xff]  ;;  %v86_v31 = vmax.f32 %v85_v26, 0.0  ;;  %v128_v32 = vld [vmem:[#allocation8 + $0x18] sm:$0xff]  ;;  %v127_v33 = vld [vmem:[#allocation8 + $0x10] sm:$0xff] }
  0x1e   :  { %109 = vmatpush.msra.mxu0 %v97_v7  ;;  %146 = vmatpush.msra.mxu1 %v136_v12  ;;  %v126_v34 = vld [vmem:[#allocation8 + $0x8] sm:$0xff]  ;;  %v125_v35 = vld [vmem:[#allocation8] sm:$0xff]  ;;  %v103_v36 = vld [vmem:[%s383_s3] sm:$0x1] }
  0x1f   :  { %v141_v40 = vld [vmem:[%s385_s5] sm:$0x1] }
  0x20   :  { %110 = vmatpush.msra.mxu0 %v96_v9  ;;  %147 = vmatpush.msra.mxu1 %v135_v14 }
  0x22   :  { %111 = vmatpush.msra.mxu0 %v95_v11  ;;  %148 = vmatpush.msra.mxu1 %v134_v16 }
  0x24   :  { %112 = vmatpush.msra.mxu0 %v94_v13  ;;  %149 = vmatpush.msra.mxu1 %v133_v18 }
  0x26   :  { %113 = vmatpush.msra.mxu0 %v93_v15  ;;  %150 = vmatpush.msra.mxu1 %v132_v20 }
  0x28   :  { %114 = vmatpush.msra.mxu0 %v92_v17  ;;  %151 = vmatpush.msra.mxu1 %v131_v24 }
  0x2a   :  { %115 = vmatpush.msra.mxu0 %v91_v19  ;;  %152 = vmatpush.msra.mxu1 %v130_v27 }
  0x2c   :  { %116 = vmatpush.msra.mxu0 %v90_v23  ;;  %153 = vmatpush.msra.mxu1 %v129_v29 }
  0x2e   :  { %117 = vmatpush.msra.mxu0 %v89_v25  ;;  %154 = vmatpush.msra.mxu1 %v128_v32 }
  0x30   :  { %118 = vmatpush.msra.mxu0 %v88_v28  ;;  %155 = vmatpush.msra.mxu1 %v127_v33 }
  0x32   :  { %119 = vmatpush.msra.mxu0 %v87_v30  ;;  %156 = vmatpush.msra.mxu1 %v126_v34 }
  0x33   :  { %120 = vmatmul.f32.vlgmr.msra.gmra.mxu0 %v86_v31 }
  0x34   :  { %157 = vmatpush.msra.mxu1 %v125_v35 }
  0xb0   :  { %v121_v37 = vpop.f32.mrf.mxu0 }
  0xb1   :  { %v122_v38 = vadd.f32 %v121_v37, %v103_v36 }
  0xb3   :  { %v124_v39 = vmax.f32 %v122_v38, 0.0 }
  0xb5   :  { %158 = vmatmul.f32.vlgmr.msra.gmra.mxu1 %v124_v39 }
 0x132   :  { %v159_v41 = vpop.f32.mrf.mxu1 }
 0x133   :  { %v160_v42 = vadd.f32 %v159_v41, %v141_v40 }
 0x135   :  { %162 = vst [vmem:[#allocation10] sm:$0x1] %v160_v42 }
 0x136   :  { %173 = dma.vmem_to_hbm [thread:$0]  %s169_s20, 16, %s171_s23, [#allocation4]  }
 0x137   :  { %315 = dma.done.wait [#allocation4], 16  }
 0x138   :  { %316 = vsyncadd [#allocation4], 4294967280 }
 0x139   :  { %178 = vsyncpa [#allocation3], 1 }
 0x13a   :  { %179 = vsyncpa [#allocation6], 1 }
 0x13b   :  { %180 = vsyncpa [#allocation9], 1 }
 0x13c   :  { %181 = vsyncpa [#allocation4], 1 }

</bundles_post_ra>
